<compile_context>
chip_gen: v7x
topology: tpu7x:2x2x1
jax: 0.10.0
libtpu: 0.0.40
codegen_flags: <defaults>
</compile_context>

<pallas_src>
import jax
import jax.numpy as jnp
from jax import lax
from jax.experimental import pallas as pl
from jax.experimental.pallas import tpu as pltpu


def _round_up(x, m):
    return ((x + m - 1) // m) * m


# ---------------------------------------------------------------------------
# Phase 1: hoisted input-side GEMM (Linear + LeakyReLU + x-side GRU gates).
# ---------------------------------------------------------------------------
def input_gemm_kernel(x_ref, wl_ref, bl_ref, wih_ref, bgi_ref, gi_ref):
    # x_ref: (TM, C)  wl_ref: (C, C)  bl_ref: (1, C)
    # wih_ref: (C, 3H)  bgi_ref: (1, 3H)  gi_ref: (TM, 3H)
    y = jnp.dot(x_ref[...], wl_ref[...], preferred_element_type=jnp.float32) + bl_ref[...]
    y = jnp.where(y > 0, y, 0.01 * y)  # LeakyReLU (PyTorch default slope 0.01)
    gi_ref[...] = (
        jnp.dot(y, wih_ref[...], preferred_element_type=jnp.float32) + bgi_ref[...]
    )


# ---------------------------------------------------------------------------
# Phase 2: serial GRU recurrence over time; one matmul per step.
# One grid point per batch block (batch is embarrassingly parallel).
# ---------------------------------------------------------------------------
def gru_recurrence_kernel(gi_ref, whh_ref, bhn_ref, out_ref):
    # gi_ref: (T, NB, 3H)  whh_ref: (H, 3H)  bhn_ref: (1, H)  out_ref: (NB, H)
    T = gi_ref.shape[0]
    NB = out_ref.shape[0]
    H = out_ref.shape[1]

    def step(t, h):
        gi = gi_ref[t]                                                        # (NB, 3H)
        gh = jnp.dot(h, whh_ref[...], preferred_element_type=jnp.float32)     # (NB, 3H)
        r = jax.nn.sigmoid(gi[:, :H] + gh[:, :H])
        z = jax.nn.sigmoid(gi[:, H:2 * H] + gh[:, H:2 * H])
        n = jnp.tanh(gi[:, 2 * H:] + r * (gh[:, 2 * H:] + bhn_ref[...]))
        return n + z * (h - n)                                                # == (1-z)*n + z*h

    h0 = jnp.zeros((NB, H), jnp.float32)
    h = lax.fori_loop(0, T, step, h0, unroll=True)
    out_ref[...] = h


def feature_extractor_pallas(chars, params):
    """chars: (T, N, C) float32. Returns (N, H) float32 (final GRU hidden state)."""
    T, N, C = chars.shape
    H = params["w_hh"].shape[0] // 3
    H3 = 3 * H

    # Fused, pre-transposed (matmul-friendly) weights. Gate column order: r | z | n.
    wl_t = params["w_lin"].T.astype(jnp.float32)           # (C, C)
    bl = params["b_lin"].reshape(1, C).astype(jnp.float32)
    wih_t = params["w_ih"].T.astype(jnp.float32)           # (C, 3H)
    whh_t = params["w_hh"].T.astype(jnp.float32)           # (H, 3H)
    b_ih = params["b_ih"].astype(jnp.float32)
    b_hh = params["b_hh"].astype(jnp.float32)

    # b_hr / b_hz fold into the input-side bias; b_hn cannot (multiplied by r).
    bias_gi = (
        b_ih + jnp.concatenate([b_hh[: 2 * H], jnp.zeros((H,), jnp.float32)])
    ).reshape(1, H3)
    bhn = b_hh[2 * H :].reshape(1, H)

    # --- batch blocking (parallel grid axis); pad batch to a multiple of NB ---
    NB = min(_round_up(N, 8), 128)
    N_pad = _round_up(N, NB)
    if N_pad != N:
        chars = jnp.pad(chars, ((0, 0), (0, N_pad - N), (0, 0)))

    # --- phase 1: one batched (T*N, C) GEMM for the whole input side ---
    M = T * N_pad
    TM = min(_round_up(M, 8), 512)
    M_pad = _round_up(M, TM)
    x_flat = chars.reshape(M, C)
    if M_pad != M:
        x_flat = jnp.pad(x_flat, ((0, M_pad - M), (0, 0)))

    gi_flat = pl.pallas_call(
        input_gemm_kernel,
        out_shape=jax.ShapeDtypeStruct((M_pad, H3), jnp.float32),
        grid_spec=pltpu.PrefetchScalarGridSpec(
            num_scalar_prefetch=0,
            grid=(M_pad // TM,),
            in_specs=[
                pl.BlockSpec((TM, C), lambda i: (i, 0)),    # x rows
                pl.BlockSpec((C, C), lambda i: (0, 0)),     # Wl^T
                pl.BlockSpec((1, C), lambda i: (0, 0)),     # bl
                pl.BlockSpec((C, H3), lambda i: (0, 0)),    # W_ih^T (fused)
                pl.BlockSpec((1, H3), lambda i: (0, 0)),    # fused input bias
            ],
            out_specs=pl.BlockSpec((TM, H3), lambda i: (i, 0)),
        ),
        compiler_params=pltpu.CompilerParams(
            dimension_semantics=("parallel",),
        ),
    )(x_flat, wl_t, bl, wih_t, bias_gi)

    gi = gi_flat[:M].reshape(T, N_pad, H3)

    # --- phase 2: serial recurrence, batch-parallel grid ---
    out = pl.pallas_call(
        gru_recurrence_kernel,
        out_shape=jax.ShapeDtypeStruct((N_pad, H), jnp.float32),
        grid_spec=pltpu.PrefetchScalarGridSpec(
            num_scalar_prefetch=0,
            grid=(N_pad // NB,),
            in_specs=[
                pl.BlockSpec((T, NB, H3), lambda b: (0, b, 0)),  # gi for this batch block
                pl.BlockSpec((H, H3), lambda b: (0, 0)),         # W_hh^T (fused)
                pl.BlockSpec((1, H), lambda b: (0, 0)),          # b_hn
            ],
            out_specs=pl.BlockSpec((NB, H), lambda b: (b, 0)),
        ),
        compiler_params=pltpu.CompilerParams(
            dimension_semantics=("parallel",),
        ),
    )(gi, whh_t, bhn)

    return out[:N]


def feature_extractor_ref(chars, params):
    """Pure-JAX reference matching PyTorch semantics exactly."""
    T, N, C = chars.shape
    H = params["w_hh"].shape[0] // 3
    w_lin, b_lin = params["w_lin"], params["b_lin"]
    w_ih, w_hh = params["w_ih"], params["w_hh"]
    b_ih, b_hh = params["b_ih"], params["b_hh"]

    h = jnp.zeros((N, H), jnp.float32)
    for t in range(T):
        x = chars[t]
        y = x @ w_lin.T + b_lin
        y = jnp.where(y > 0, y, 0.01 * y)
        gi = y @ w_ih.T + b_ih
        gh = h @ w_hh.T + b_hh
        i_r, i_z, i_n = gi[:, :H], gi[:, H:2 * H], gi[:, 2 * H:]
        h_r, h_z, h_n = gh[:, :H], gh[:, H:2 * H], gh[:, 2 * H:]
        r = jax.nn.sigmoid(i_r + h_r)
        z = jax.nn.sigmoid(i_z + h_z)
        n = jnp.tanh(i_n + r * h_n)
        h = (1.0 - z) * n + z * h
    return h


def init_params(key, num_chars, num_feats):
    """Deterministic synthetic parameters (PyTorch-layout shapes)."""
    C, H = num_chars, num_feats
    ks = jax.random.split(key, 6)
    s_lin = 1.0 / jnp.sqrt(C)
    s_gru = 1.0 / jnp.sqrt(H)
    return {
        "w_lin": jax.random.uniform(ks[0], (C, C), jnp.float32, -s_lin, s_lin),
        "b_lin": jax.random.uniform(ks[1], (C,), jnp.float32, -s_lin, s_lin),
        "w_ih": jax.random.uniform(ks[2], (3 * H, C), jnp.float32, -s_gru, s_gru),
        "w_hh": jax.random.uniform(ks[3], (3 * H, H), jnp.float32, -s_gru, s_gru),
        "b_ih": jax.random.uniform(ks[4], (3 * H,), jnp.float32, -s_gru, s_gru),
        "b_hh": jax.random.uniform(ks[5], (3 * H,), jnp.float32, -s_gru, s_gru),
    }


if __name__ == "__main__":
    T, N, C, H = 8, 8, 16, 32   # seq_len, batch, num_chars, num_feats

    key = jax.random.PRNGKey(0)
    k_params, k_x = jax.random.split(key)
    params = init_params(k_params, C, H)
    chars = jax.random.normal(k_x, (T, N, C), jnp.float32)

    feats = feature_extractor_pallas(chars, params)
    feats = jax.block_until_ready(feats)

    ref = feature_extractor_ref(chars, params)
    assert feats.shape == (N, H)
    assert jnp.allclose(feats, ref, atol=1e-5, rtol=1e-5), "mismatch vs JAX reference"

    print("KERNEL_OK")
</pallas_src>

<mosaic_0001>
module attributes {stable_mosaic.version = 11 : i64} {
  func.func @input_gemm_kernel(%arg0: i32, %arg1: memref<64x16xf32, #tpu.memory_space<vmem>>, %arg2: memref<16x16xf32, #tpu.memory_space<vmem>>, %arg3: memref<1x16xf32, #tpu.memory_space<vmem>>, %arg4: memref<16x96xf32, #tpu.memory_space<vmem>>, %arg5: memref<1x96xf32, #tpu.memory_space<vmem>>, %arg6: memref<64x96xf32, #tpu.memory_space<vmem>>) attributes {dimension_semantics = [#tpu.dimension_semantics<parallel>], iteration_bounds = array<i64: 1>, scalar_prefetch = 0 : i64, scratch_operands = 0 : i64, tpu.core_type = #tpu.core_type<tc>, window_params = [{transform_indices = @transform_0, window_bounds = array<i64: 64, 16>}, {pipeline_mode = #tpu.pipeline_mode<synchronous>, transform_indices = @transform_1, window_bounds = array<i64: 16, 16>}, {pipeline_mode = #tpu.pipeline_mode<synchronous>, transform_indices = @transform_2, window_bounds = array<i64: 1, 16>}, {pipeline_mode = #tpu.pipeline_mode<synchronous>, transform_indices = @transform_3, window_bounds = array<i64: 16, 96>}, {pipeline_mode = #tpu.pipeline_mode<synchronous>, transform_indices = @transform_4, window_bounds = array<i64: 1, 96>}, {transform_indices = @transform_5, window_bounds = array<i64: 64, 96>}]} {
    %c0 = arith.constant 0 : index
    %c0_0 = arith.constant 0 : index
    %0 = vector.load %arg1[%c0, %c0_0] : memref<64x16xf32, #tpu.memory_space<vmem>>, vector<64x16xf32>
    %c0_1 = arith.constant 0 : index
    %c0_2 = arith.constant 0 : index
    %1 = vector.load %arg2[%c0_1, %c0_2] : memref<16x16xf32, #tpu.memory_space<vmem>>, vector<16x16xf32>
    %cst = arith.constant dense<0.000000e+00> : vector<64x16xf32>
    %2 = tpu.matmul %0, %1, %cst {dimension_numbers = #tpu.dot_dimension_numbers<[1], [0], [0], [1], [0, 0, 1, 1], [], []>} : vector<64x16xf32>, vector<16x16xf32>, vector<64x16xf32> -> vector<64x16xf32>
    %c0_3 = arith.constant 0 : index
    %c0_4 = arith.constant 0 : index
    %3 = vector.load %arg3[%c0_3, %c0_4] : memref<1x16xf32, #tpu.memory_space<vmem>>, vector<1x16xf32>
    %4 = vector.broadcast %3 : vector<1x16xf32> to vector<64x16xf32>
    %5 = arith.addf %2, %4 : vector<64x16xf32>
    %cst_5 = arith.constant 0.000000e+00 : f32
    %6 = vector.broadcast %cst_5 : f32 to vector<64x16xf32>
    %7 = arith.cmpf ogt, %5, %6 : vector<64x16xf32>
    %cst_6 = arith.constant 0.00999999977 : f32
    %8 = vector.broadcast %cst_6 : f32 to vector<64x16xf32>
    %9 = arith.mulf %8, %5 : vector<64x16xf32>
    %10 = arith.select %7, %5, %9 : vector<64x16xi1>, vector<64x16xf32>
    %c0_7 = arith.constant 0 : index
    %c0_8 = arith.constant 0 : index
    %11 = vector.load %arg4[%c0_7, %c0_8] : memref<16x96xf32, #tpu.memory_space<vmem>>, vector<16x96xf32>
    %cst_9 = arith.constant dense<0.000000e+00> : vector<64x96xf32>
    %12 = tpu.matmul %10, %11, %cst_9 {dimension_numbers = #tpu.dot_dimension_numbers<[1], [0], [0], [1], [0, 0, 1, 1], [], []>} : vector<64x16xf32>, vector<16x96xf32>, vector<64x96xf32> -> vector<64x96xf32>
    %c0_10 = arith.constant 0 : index
    %c0_11 = arith.constant 0 : index
    %13 = vector.load %arg5[%c0_10, %c0_11] : memref<1x96xf32, #tpu.memory_space<vmem>>, vector<1x96xf32>
    %14 = vector.broadcast %13 : vector<1x96xf32> to vector<64x96xf32>
    %15 = arith.addf %12, %14 : vector<64x96xf32>
    %c0_12 = arith.constant 0 : index
    %c0_13 = arith.constant 0 : index
    %16 = vector.load %arg6[%c0_12, %c0_13] : memref<64x96xf32, #tpu.memory_space<vmem>>, vector<64x96xf32>
    tpu.vector_store %arg6[%c0_12, %c0_13], %15 {strides = array<i32>} : memref<64x96xf32, #tpu.memory_space<vmem>>, vector<64x96xf32>,
    return
  }
  func.func @transform_0(%arg0: i32) -> (i32, i32) {
    %c0_i32 = arith.constant 0 : i32
    %c0_i32_0 = arith.constant 0 : i32
    return %arg0, %c0_i32 : i32, i32
  }
  func.func @transform_1(%arg0: i32) -> (i32, i32) {
    %c0_i32 = arith.constant 0 : i32
    %c0_i32_0 = arith.constant 0 : i32
    %c0_i32_1 = arith.constant 0 : i32
    return %c0_i32, %c0_i32_0 : i32, i32
  }
  func.func @transform_2(%arg0: i32) -> (i32, i32) {
    %c0_i32 = arith.constant 0 : i32
    %c0_i32_0 = arith.constant 0 : i32
    %c0_i32_1 = arith.constant 0 : i32
    return %c0_i32, %c0_i32_0 : i32, i32
  }
  func.func @transform_3(%arg0: i32) -> (i32, i32) {
    %c0_i32 = arith.constant 0 : i32
    %c0_i32_0 = arith.constant 0 : i32
    %c0_i32_1 = arith.constant 0 : i32
    return %c0_i32, %c0_i32_0 : i32, i32
  }
  func.func @transform_4(%arg0: i32) -> (i32, i32) {
    %c0_i32 = arith.constant 0 : i32
    %c0_i32_0 = arith.constant 0 : i32
    %c0_i32_1 = arith.constant 0 : i32
    return %c0_i32, %c0_i32_0 : i32, i32
  }
  func.func @transform_5(%arg0: i32) -> (i32, i32) {
    %c0_i32 = arith.constant 0 : i32
    %c0_i32_0 = arith.constant 0 : i32
    return %arg0, %c0_i32 : i32, i32
  }
}

</mosaic_0001>

<bundles_post_ra>
// kernel: tpu_custom_call.1
= control target key start
LH: loop header
LB: loop body
LE: loop exit
PB: predicated region body
PF: predicated region fallthrough
CT: control target
= control target key end

     0   :  { %vm38_vm0 = vcmask 130048   ;;  %s571_s0 = inlined_call_operand.vmem [shape: f32[64,16], index: 0, kind: input, shape index: {}]   ;;  %s572_s1 = inlined_call_operand.vmem [shape: f32[16,16], index: 1, kind: input, shape index: {}]   ;;  %s573_s2 = inlined_call_operand.vmem [shape: f32[1,16], index: 2, kind: input, shape index: {}]   ;;  %s574_s3 = inlined_call_operand.vmem [shape: f32[16,96], index: 3, kind: input, shape index: {}]   ;;  %s575_s4 = inlined_call_operand.vmem [shape: f32[1,96], index: 4, kind: input, shape index: {}]   ;;  %s576_s5 = inlined_call_operand.hbm [shape: f32[64,96], index: 5, kind: output, shape index: {}]  }
   0x1   :  { %v29_v0 = vld [vmem:[%s572_s1] sm:$0xff]  ;;  %v30_v1 = vld [vmem:[%s572_s1 + $0x8] sm:$0xff] }
   0x2   :  { %v21_v2 = vld [vmem:[%s571_s0] sm:$0xff]  ;;  %v425_v3 = vpack.c.bf16 %v30_v1, %v29_v0 }
   0x3   :  { %397 = vmatprep.mubr.msk.f32.mxu0 %vm38_vm0, %v21_v2 }
   0x4   :  { %426 = vmatprep.subr.bf16.mxu0 %v425_v3 }
   0x5   :  { %10 = vsyncpa [#allocation3], 0  ;;  %428 = vmatpush3.bf16.msra.mxu0 %v425_v3  ;;  %v22_v4 = vld [vmem:[%s571_s0 + $0x8] sm:$0xff]  ;;  %v23_v5 = vld [vmem:[%s571_s0 + $0x10] sm:$0xff]  ;;  %vm330_vm9 = vcmask 785408  }
   0x6   :  { %v24_v6 = vld [vmem:[%s571_s0 + $0x18] sm:$0xff]  ;;  %v25_v7 = vld [vmem:[%s571_s0 + $0x20] sm:$0xff]  ;;  %v26_v8 = vld [vmem:[%s571_s0 + $0x28] sm:$0xff] }
   0x7   :  { %v27_v9 = vld [vmem:[%s571_s0 + $0x30] sm:$0xff]  ;;  %v28_v10 = vld [vmem:[%s571_s0 + $0x38] sm:$0xff]  ;;  %v192_v11 = vld [vmem:[%s574_s3] sm:$0xff] }
   0x8   :  { %398 = vmatmul.mubr.msk.f32.vlgmr.msra.gmra.mrb[0].mxu0 %vm38_vm0, %v22_v4  ;;  %v193_v12 = vld [vmem:[%s574_s3 + $0x8] sm:$0xff]  ;;  %v355_v14 = vld [vmem:[%s573_s2] ss:$0 sm:$0xff]  ;;  %s460_s3 = smov [#allocation2]  }
   0x9   :  { %400 = vmatprep.mubr.msk.f32.mxu0 %vm38_vm0, %v23_v5  ;;  %v429_v13 = vpack.c.bf16 %v193_v12, %v192_v11  ;;  %v364_v47 = vld [vmem:[%s575_s4] ss:$0 sm:$0xff]  ;;  %s344_s4 = sshll.u32 %s460_s3, 4  ;;  %s345_s4 = int_to_ptr.vmem [resolvable:$true] %s344_s4 }
   0xa   :  { %s436_s18 = scalar_lea.vmem %s345_s4, 1024  ;;  %p441_p1 = scmp.lt.s32.totalorder %s345_s4, %s345_s4 }
   0xb   :  { %430 = vmatprep.subr.bf16.mxu1 %v429_v13  ;;  %p437_p0 = scmp.ne.s32.totalorder %s345_s4, %s436_s18  ;;  %p442_p2 = scmp.lt.s32.totalorder %s436_s18, %s436_s18 }
   0xc   :  { %401 = vmatmul.mubr.msk.f32.gmra.mrb[2].mxu0 %vm38_vm0, %v24_v6  ;;  %432 = vmatpush3.bf16.msra.mxu1 %v429_v13 }
   0xd   :  { %403 = vmatprep.mubr.msk.f32.mxu0 %vm38_vm0, %v25_v7  ;;  %p443_p3 = por %p442_p2, %p441_p1 }
   0xf   :  { %p444_p4 = pnand %p443_p3, %p437_p0 }
  0x10   :  { %404 = vmatmul.mubr.msk.f32.gmra.mrb[4].mxu0 %vm38_vm0, %v26_v8 }
  0x11   :  { %406 = vmatprep.mubr.msk.f32.mxu0 %vm38_vm0, %v27_v9 }
  0x14   :  { %407 = vmatmul.mubr.msk.f32.gmra.mrb[6].mxu0 %vm38_vm0, %v28_v10 }
  0xdb   :  { %v399_v15 = vpop.f32.mrb[0].mxu0 }
  0xdc   :  { %v135_v16 = vadd.f32 %v399_v15, %v355_v14  ;;  %v129_v17 = vpop.f32.mrb[1].mxu0 }
  0xdd   :  { %v130_v18 = vadd.f32 %v355_v14, %v129_v17 }
  0xde   :  { %v177_v19 = vmul.f32 0.01, %v135_v16  ;;  %vm169_vm1 = vcmp.gt.f32.partialorder %v135_v16, 0.0 }
  0xdf   :  { %v402_v20 = vpop.f32.mrb[2].mxu0  ;;  %vm168_vm2 = vcmp.gt.f32.partialorder %v130_v18, 0.0  ;;  %v176_v21 = vmul.f32 0.01, %v130_v18 }
  0xe0   :  { %v145_v22 = vadd.f32 %v402_v20, %v355_v14  ;;  %v139_v23 = vpop.f32.mrb[3].mxu0  ;;  %v185_v27 = vsel %vm169_vm1, %v135_v16, %v177_v19 }
  0xe1   :  { %v140_v24 = vadd.f32 %v355_v14, %v139_v23  ;;  %v184_v25 = vsel %vm168_vm2, %v130_v18, %v176_v21 }
  0xe2   :  { %v179_v26 = vmul.f32 0.01, %v145_v22  ;;  %413 = vmatprep.mubr.msk.f32.mxu1 %vm38_vm0, %v184_v25  ;;  %vm171_vm3 = vcmp.gt.f32.partialorder %v145_v22, 0.0 }
  0xe3   :  { %vm170_vm4 = vcmp.gt.f32.partialorder %v140_v24, 0.0  ;;  %v178_v28 = vmul.f32 0.01, %v140_v24  ;;  %v405_v29 = vpop.f32.mrb[4].mxu0  ;;  %414 = vmatmul.mubr.msk.f32.vlgmr.msra.gmra.mrb[0].mxu1 %vm38_vm0, %v185_v27 }
  0xe4   :  { %v155_v30 = vadd.f32 %v405_v29, %v355_v14  ;;  %v149_v31 = vpop.f32.mrb[5].mxu0  ;;  %v187_v35 = vsel %vm171_vm3, %v145_v22, %v179_v26 }
  0xe5   :  { %v150_v32 = vadd.f32 %v355_v14, %v149_v31  ;;  %v186_v33 = vsel %vm170_vm4, %v140_v24, %v178_v28 }
  0xe6   :  { %v181_v34 = vmul.f32 0.01, %v155_v30  ;;  %416 = vmatprep.mubr.msk.f32.mxu1 %vm38_vm0, %v186_v33  ;;  %vm173_vm5 = vcmp.gt.f32.partialorder %v155_v30, 0.0 }
  0xe7   :  { %vm172_vm6 = vcmp.gt.f32.partialorder %v150_v32, 0.0  ;;  %v180_v36 = vmul.f32 0.01, %v150_v32  ;;  %v408_v37 = vpop.f32.mrb[6].mxu0  ;;  %417 = vmatmul.mubr.msk.f32.gmra.mrb[2].mxu1 %vm38_vm0, %v187_v35 }
  0xe8   :  { %v165_v38 = vadd.f32 %v408_v37, %v355_v14  ;;  %v159_v39 = vpop.f32.mrb[7].mxu0  ;;  %v189_v43 = vsel %vm173_vm5, %v155_v30, %v181_v34 }
  0xe9   :  { %v160_v40 = vadd.f32 %v355_v14, %v159_v39  ;;  %v188_v41 = vsel %vm172_vm6, %v150_v32, %v180_v36 }
  0xea   :  { %v183_v42 = vmul.f32 0.01, %v165_v38  ;;  %419 = vmatprep.mubr.msk.f32.mxu1 %vm38_vm0, %v188_v41  ;;  %vm175_vm7 = vcmp.gt.f32.partialorder %v165_v38, 0.0 }
  0xeb   :  { %vm174_vm8 = vcmp.gt.f32.partialorder %v160_v40, 0.0  ;;  %v182_v44 = vmul.f32 0.01, %v160_v40  ;;  %420 = vmatmul.mubr.msk.f32.gmra.mrb[4].mxu1 %vm38_vm0, %v189_v43 }
  0xec   :  { %v191_v46 = vsel %vm175_vm7, %v165_v38, %v183_v42 }
  0xed   :  { %v190_v45 = vsel %vm174_vm8, %v160_v40, %v182_v44 }
  0xee   :  { %422 = vmatprep.mubr.msk.f32.mxu1 %vm38_vm0, %v190_v45 }
  0xef   :  { %423 = vmatmul.mubr.msk.f32.gmra.mrb[6].mxu1 %vm38_vm0, %v191_v46 }
 0x1b6   :  { %v415_v48 = vpop.f32.mrb[0].mxu1 }
 0x1b7   :  { %v297_v49 = vadd.f32 %v415_v48, %v364_v47  ;;  %v291_v50 = vpop.f32.mrb[1].mxu1 }
 0x1b8   :  { %v292_v51 = vadd.f32 %v364_v47, %v291_v50 }
 0x1b9   :  { %332 = vst.msk [vmem:[#allocation2 + $0x8] sm:$0xff] %vm330_vm9, %v297_v49 }
 0x1ba   :  { %331 = vst.msk [vmem:[#allocation2] sm:$0xff] %vm330_vm9, %v292_v51  ;;  %v418_v52 = vpop.f32.mrb[2].mxu1 }
 0x1bb   :  { %v307_v53 = vadd.f32 %v418_v52, %v364_v47  ;;  %v301_v54 = vpop.f32.mrb[3].mxu1 }
 0x1bc   :  { %v302_v55 = vadd.f32 %v364_v47, %v301_v54 }
 0x1bd   :  { %334 = vst.msk [vmem:[#allocation2 + $0x18] sm:$0xff] %vm330_vm9, %v307_v53 }
 0x1be   :  { %333 = vst.msk [vmem:[#allocation2 + $0x10] sm:$0xff] %vm330_vm9, %v302_v55  ;;  %v421_v56 = vpop.f32.mrb[4].mxu1 }
 0x1bf   :  { %v317_v57 = vadd.f32 %v421_v56, %v364_v47  ;;  %v311_v58 = vpop.f32.mrb[5].mxu1 }
 0x1c0   :  { %v312_v59 = vadd.f32 %v364_v47, %v311_v58 }
 0x1c1   :  { %336 = vst.msk [vmem:[#allocation2 + $0x28] sm:$0xff] %vm330_vm9, %v317_v57 }
 0x1c2   :  { %335 = vst.msk [vmem:[#allocation2 + $0x20] sm:$0xff] %vm330_vm9, %v312_v59  ;;  %v424_v60 = vpop.f32.mrb[6].mxu1 }
 0x1c3   :  { %v327_v61 = vadd.f32 %v424_v60, %v364_v47  ;;  %v321_v62 = vpop.f32.mrb[7].mxu1 }
 0x1c4   :  { %v322_v63 = vadd.f32 %v364_v47, %v321_v62 }
 0x1c5   :  { %338 = vst.msk [vmem:[#allocation2 + $0x38] sm:$0xff] %vm330_vm9, %v327_v61 }
 0x1c6   :  { %337 = vst.msk [vmem:[#allocation2 + $0x30] sm:$0xff] %vm330_vm9, %v322_v63 }
 0x1c7   :  { %447 = shalt.err (!%p444_p4)
}
 0x1c8   :  { %s448_s21 = scalar_lea.hbm %s576_s5, 1024 }
 0x1c9   :  { %p449_p5 = scmp.ne.s32.totalorder %s576_s5, %s448_s21  ;;  %p452_p6 = scmp.lt.u32.totalorder %s448_s21, %s576_s5 }
 0x1cb   :  { %p454_p7 = pnand %p452_p6, %p449_p5 }
 0x1cd   :  { %457 = shalt.err (!%p454_p7)
}
 0x1ce   :  { %s461_s26 = smov 128   ;;  %s462_s27 = smov 8  }
 0x1cf   :  { %350 = dma.vmem_to_hbm [thread:$0]  %s345_s4, 1024, %s576_s5, [#allocation3], %s461_s26, %s461_s26, %s462_s27  }
 0x1d0   :  { %458 = dma.done.wait [#allocation3], 1024  }
 0x1d1   :  { %459 = vsyncadd [#allocation3], 4294966272 }
 0x1d2   :  { %354 = vsyncpa [#allocation3], 1 }

</bundles_post_ra>
